<compile_context>
chip_gen: v5e
topology: v5e:2x2
jax: 0.10.0
libtpu: 0.0.40
codegen_flags: <defaults>
</compile_context>

<pallas_src>
import functools

import jax
import jax.numpy as jnp
import numpy as np
from jax.experimental import pallas as pl
from jax.experimental.pallas import tpu as pltpu


def _round_up(a, b):
    return -(-a // b) * b


def _crop_kernel(x_ref, o_ref, *, w_start):
    # x_ref block: (blk, h_blk_in, W); o_ref block: (blk, h_blk_out, W_out).
    # Static slice of the VMEM tile -> straight copy into the output block.
    h_o = o_ref.shape[1]
    w_o = o_ref.shape[2]
    o_ref[...] = x_ref[:, :h_o, w_start:w_start + w_o]


def croper2d(x, crop_shape, *, block_budget_bytes=4 * 1024 * 1024):
    """Pallas equivalent of Croper2D(*crop_shape)(x) for NCHW input."""
    n, c, h, w = x.shape
    h_req, w_req = crop_shape

    diff = w - w_req
    assert diff >= 1, (
        "Croper2D module semantics: W_out must be < W (otherwise the torch "
        "slice diff//2 : -(diff//2) is empty)."
    )
    # Exact torch slice semantics (handles odd diff: output is W_out + 1 wide).
    w_start = diff // 2
    w_stop = w - diff // 2
    w_out = w_stop - w_start
    h_out = min(h_req, h)  # torch top-crop clamps to H.

    # Free, layout-preserving collapse of (N, C) into one axis.
    nc = n * c
    x2 = x.reshape(nc, h, w)

    itemsize = jnp.dtype(x.dtype).itemsize
    sub = max(8, 32 // max(itemsize, 1))  # sublane multiple: 8 f32 / 16 bf16 / 32 i8
    lane = 128
    w_pad = _round_up(w, lane)
    w_out_pad = _round_up(w_out, lane)

    # Input H block when a whole cropped image fits in one block: only the top
    # rows we actually need, rounded up to the sublane multiple (or full H).
    h_in_full = min(h, _round_up(h_out, sub))

    # VMEM-padded bytes of one image's input slab + output slab.
    in_slab = _round_up(h_in_full, sub) * w_pad * itemsize
    out_slab = _round_up(h_out, sub) * w_out_pad * itemsize
    slab = in_slab + out_slab

    if slab <= block_budget_bytes:
        # Case 1: pack several images per grid step; no H tiling needed.
        h_blk_in, h_blk_out, num_h_blocks = h_in_full, h_out, 1
        blk = max(1, min(nc, block_budget_bytes // slab))
        if nc >= 2:
            # Keep >= 2 grid steps so both v7x TensorCores get work.
            blk = min(blk, pl.cdiv(nc, 2))
        num_nc_blocks = pl.cdiv(nc, blk)
        if num_nc_blocks > 1 and num_nc_blocks % 2 != 0:
            # Prefer an even number of steps for v7x megacore splitting.
            for b in range(blk - 1, max(blk // 2, 0), -1):
                if pl.cdiv(nc, b) % 2 == 0:
                    blk = b
                    num_nc_blocks = pl.cdiv(nc, b)
                    break
    else:
        # Case 2: a single image exceeds the per-block VMEM budget -> tile H.
        blk = 1
        row_bytes = (w_pad + w_out_pad) * itemsize
        h_blk = max(sub, (block_budget_bytes // row_bytes) // sub * sub)
        h_blk = min(h_blk, _round_up(h_out, sub))
        if h_blk >= h_out:
            # Degenerate: budget overshoot was marginal; fall back to case 1.
            h_blk_in, h_blk_out, num_h_blocks = h_in_full, h_out, 1
        else:
            h_blk_in = h_blk_out = h_blk
            num_h_blocks = pl.cdiv(h_out, h_blk)
        num_nc_blocks = nc

    kernel = functools.partial(_crop_kernel, w_start=w_start)

    out2 = pl.pallas_call(
        kernel,
        out_shape=jax.ShapeDtypeStruct((nc, h_out, w_out), x.dtype),
        grid_spec=pltpu.PrefetchScalarGridSpec(
            num_scalar_prefetch=0,
            grid=(num_nc_blocks, num_h_blocks),
            in_specs=[
                # Second-to-last dim is a multiple of the sublane quantum (or
                # the full H); last dim is the full W -> always accepted by
                # the (8,128)/full-dim BlockSpec rule.
                pl.BlockSpec((blk, h_blk_in, w), lambda i, j: (i, j, 0)),
            ],
            out_specs=pl.BlockSpec(
                (blk, h_blk_out, w_out), lambda i, j: (i, j, 0)
            ),
        ),
        compiler_params=pltpu.CompilerParams(
            dimension_semantics=("parallel", "parallel"),
        ),
    )(x2)

    # Free metadata reshape back to NCHW-cropped.
    return out2.reshape(n, c, h_out, w_out)


if __name__ == "__main__":
    key = jax.random.PRNGKey(0)
    N, C, H, W = 2, 4, 16, 16
    crop_shape = (12, 10)  # Croper2D(12, 10)

    x = jax.random.normal(key, (N, C, H, W), dtype=jnp.float32)

    out = croper2d(x, crop_shape)
    out = jax.block_until_ready(out)

    # Pure-numpy reference reproducing the PyTorch slicing semantics exactly.
    x_np = np.asarray(x)
    diff = W - crop_shape[1]
    ref = x_np[:, :, : crop_shape[0], diff // 2 : -(diff // 2)]

    assert out.shape == ref.shape, (out.shape, ref.shape)
    np.testing.assert_allclose(np.asarray(out), ref, rtol=0, atol=0)
    print("KERNEL_OK")
</pallas_src>

<mosaic_0001>
module attributes {stable_mosaic.version = 11 : i64} {
  func.func @_crop_kernel(%arg0: i32, %arg1: i32, %arg2: memref<4x16x16xf32, #tpu.memory_space<vmem>>, %arg3: memref<4x12x10xf32, #tpu.memory_space<vmem>>) attributes {dimension_semantics = [#tpu.dimension_semantics<parallel>, #tpu.dimension_semantics<parallel>], iteration_bounds = array<i64: 2, 1>, scalar_prefetch = 0 : i64, scratch_operands = 0 : i64, tpu.core_type = #tpu.core_type<tc>, window_params = [{transform_indices = @transform_0, window_bounds = array<i64: 4, 16, 16>}, {transform_indices = @transform_1, window_bounds = array<i64: 4, 12, 10>}]} {
    %c0 = arith.constant 0 : index
    %c0_0 = arith.constant 0 : index
    %c3 = arith.constant 3 : index
    %0 = vector.load %arg2[%c0, %c0_0, %c3] : memref<4x16x16xf32, #tpu.memory_space<vmem>>, vector<4x12x10xf32>
    %c0_1 = arith.constant 0 : index
    %c0_2 = arith.constant 0 : index
    %c0_3 = arith.constant 0 : index
    %1 = vector.load %arg3[%c0_1, %c0_2, %c0_3] : memref<4x12x10xf32, #tpu.memory_space<vmem>>, vector<4x12x10xf32>
    tpu.vector_store %arg3[%c0_1, %c0_2, %c0_3], %0 {strides = array<i32>} : memref<4x12x10xf32, #tpu.memory_space<vmem>>, vector<4x12x10xf32>,
    return
  }
  func.func @transform_0(%arg0: i32, %arg1: i32) -> (i32, i32, i32) {
    %c0_i32 = arith.constant 0 : i32
    %c0_i32_0 = arith.constant 0 : i32
    return %arg0, %arg1, %c0_i32 : i32, i32, i32
  }
  func.func @transform_1(%arg0: i32, %arg1: i32) -> (i32, i32, i32) {
    %c0_i32 = arith.constant 0 : i32
    %c0_i32_0 = arith.constant 0 : i32
    return %arg0, %arg1, %c0_i32 : i32, i32, i32
  }
}

</mosaic_0001>

<bundles_post_ra>
// kernel: tpu_custom_call.1
= control target key start
LH: loop header
LB: loop body
LE: loop exit
PB: predicated region body
PF: predicated region fallthrough
CT: control target
= control target key end

     0   :  { %6 = vsyncpa [#allocation3], 0  ;;  %s582_s0 = inlined_call_operand.hbm [shape: f32[8,16,16], index: 0, kind: input, shape index: {}]   ;;  %s583_s1 = inlined_call_operand.vmem [shape: f32[8,12,10], index: 1, kind: output, shape index: {}]  }
   0x1   :  { %8 = vsyncpa [#allocation3 + $0x1], 0  ;;  %s491_s6 = smov 0   ;;  %s493_s7 = smov 0  }
   0x2   :  { %s495_s8 = smov 0   ;;  %s497_s9 = smov 0  }
   0x3   :  { %s499_s10 = smov 0   ;;  %s501_s11 = smov 0  }
   0x4 LB: > { %s320_s12 = sadd.s32 4294967295, %s476_s11   ;;  %s26_s13 = sadd.s32 1, %s472_s10  ;;  %s476_s11 = sphi %s501_s11, %s14_s11   ;;  %s472_s10 = sphi %s499_s10, %s590_s10   ;;  %s468_s9 = sphi %s497_s9, %s589_s9   ;;  %s464_s8 = sphi %s495_s8, %s588_s8   ;;  %s460_s7 = sphi %s493_s7, %s587_s7   ;;  %s456_s6 = sphi %s491_s6, %s586_s6  }
   0x5   : > { %p28_p0 = scmp.ge.s32.totalorder %s26_s13, 2  ;;  %s35_s14 = sadd.s32 1, %s464_s8 }
   0x6   : > { %p42_p1 = scmp.ne.s32.totalorder %s464_s8, %s460_s7  ;;  %p43_p2 = scmp.eq.s32.totalorder %s476_s11, 0 }
   0x7   : > { %s592_s13 = smov (%p28_p0, %s26_s13), 0  ;;  %p48_p4 = scmp.ne.s32.totalorder %s460_s7, %s456_s6 }
   0x8   : > { %p527_p3 = por %p43_p2, %p42_p1  ;;  %s30_s16 = ssub.s32 %s472_s10, %s592_s13 }
   0x9   : > { %p49_p5 = scmp.eq.s32.totalorder %s320_s12, 0  ;;  %p33_p6 = scmp.eq.s32.totalorder %s30_s16, 0 }
   0xa   : > { %p344_p8 = scmp.lt.s32.totalorder %s476_s11, 2  ;;  %s100_s19 = sand.u32 1, %s464_s8  }
   0xb   : > { %p534_p7 = por %p49_p5, %p48_p4  ;;  %s336_s20 = sshll.u32 %s472_s10, 6 }
   0xc   : > { %s540_s18 = scalar_select %p33_p6, %s464_s8, %s35_s14  }
   0xd   : > { %s324_s21 = sshll.u32 %s100_s19, 6  ;;  %s112_s24 = scalar_lea.hbm %s582_s0, %s336_s20 }
   0xe   : > { %s113_s25 = sshll.u32 %s112_s24, 4  ;;  %s104_s26 = scalar_lea.vmem [#allocation2], %s324_s21  ;;  %s114_s25 = int_to_ptr.hbm [resolvable:$true] %s113_s25 }
   0xf   : > { %s115_s27 = sshll.u32 %s104_s26, 4  ;;  %p341_p9 = pnand %p344_p8, %p527_p3  ;;  %s116_s27 = int_to_ptr.vmem [resolvable:$true] %s115_s27 }
  0x10   : > { %p328_p10 = scmp.ge.s32.totalorder %s476_s11, 1  ;;  %p123_p11 = scmp.lt.s32.totalorder %s476_s11, 3 }
  0x11   : > { %s101_s28 = scalar_lea.sflag [#allocation3], %s100_s19  ;;  %s478_s29 = smov 128  }
  0x12   : > { %s479_s30 = smov 8   ;;  %p124_p12 = pnand %p328_p10, %p123_p11 }
  0x13   : > { %343 = dma.hbm_to_vmem [thread:$0]  (!%p341_p9), %s114_s25, 1024, %s116_s27, %s101_s28, %s478_s29, %s478_s29, %s479_s30  }
  0x14   : > { %127 = sbr.rel (%p124_p12) target bundleno = 160 (0xa0), region = 24  ;;  %s129_s2 = sand.u32 (!%p124_p12), 1, %s460_s7  }
  0x15   : > { %s329_s3 = sshll.u32 (!%p124_p12), %s129_s2, 6  ;;  %s130_s4 = scalar_lea.sflag (!%p124_p12), [#allocation3], %s129_s2 }
  0x16   : > { %s133_s5 = scalar_lea.vmem (!%p124_p12), [#allocation2], %s329_s3 }
  0x19   : > { %451 = dma.done.wait (%p534_p7), %s130_s4, 1024  }
  0x1a   : > { %453 = vsyncadd (%p534_p7), %s130_s4, 4294966272  ;;  %v174_v0 = vld [vmem:[%s133_s5 + $0x10] sm:$0xff]  ;;  %v172_v1 = vld [vmem:[%s133_s5] sm:$0xff]  ;;  %s480_s6 = smov 125   ;;  %s330_s12 = sshll.u32 %s468_s9, 2  ;;  %vm212_vm0 = vcmask 80896  }
  0x1b   : > { %192 = vrot.lane.b32.xlu1 %v174_v0, %s480_s6  ;;  %188 = vrot.lane.b32.xlu0 %v172_v1, %s480_s6  ;;  %v176_v2 = vld [vmem:[%s133_s5 + $0x20] sm:$0xff]  ;;  %v175_v3 = vld [vmem:[%s133_s5 + $0x18] sm:$0xf]  ;;  %p162_p13 = scmp.lt.s32.totalorder %s330_s12, 7  ;;  %vm214_vm1 = vcmask 76800  }
  0x1c   : > { %196 = vrot.lane.b32.xlu2 %v176_v2, %s480_s6  ;;  %v173_v4 = vld [vmem:[%s133_s5 + $0x8] sm:$0xf]  ;;  %v179_v6 = vld [vmem:[%s133_s5 + $0x38] sm:$0xf]  ;;  %v178_v7 = vld [vmem:[%s133_s5 + $0x30] sm:$0xff] }
  0x1d   : > { %v177_v5 = vld [vmem:[%s133_s5 + $0x28] sm:$0xf]  ;;  %s594_s12 = smov (!%p162_p13, %s330_s12), 7 }
  0x1e   : > { %s337_s14 = sshll.u32 %s594_s12, 4 }
  0x1f   : > { %s169_s17 = scalar_lea.vmem %s583_s1, %s337_s14 }
  0x23   : > { %194 = vrot.lane.b32.xlu1 %v175_v3, %s480_s6  ;;  %190 = vrot.lane.b32.xlu0 %v173_v4, %s480_s6 }
  0x24   : > { %198 = vrot.lane.b32.xlu2 %v177_v5, %s480_s6 }
  0x2b   : > { %202 = vrot.lane.b32.xlu1 %v179_v6, %s480_s6  ;;  %200 = vrot.lane.b32.xlu0 %v178_v7, %s480_s6 }
  0x76   : > { %v197_v8 = vpop.permute.xlu2 %196 }
  0x77   : > { %218 = vst.msk [vmem:[%s169_s17 + $0x20] sm:$0xff] %vm212_vm0, %v197_v8 }
  0x7e   : > { %v199_v11 = vpop.permute.xlu2 %198 }
  0x7f   : > { %219 = vst.msk [vmem:[%s169_s17 + $0x28] sm:$0xf] %vm214_vm1, %v199_v11 }
  0x8d   : > { %v193_v9 = vpop.permute.xlu1 %192  ;;  %v189_v10 = vpop.permute.xlu0 %188 }
  0x8e   : > { %213 = vst.msk [vmem:[%s169_s17] sm:$0xff] %vm212_vm0, %v189_v10 }
  0x8f   : > { %216 = vst.msk [vmem:[%s169_s17 + $0x10] sm:$0xff] %vm212_vm0, %v193_v9 }
  0x95   : > { %v195_v12 = vpop.permute.xlu1 %194  ;;  %v191_v13 = vpop.permute.xlu0 %190 }
  0x96   : > { %215 = vst.msk [vmem:[%s169_s17 + $0x8] sm:$0xf] %vm214_vm1, %v191_v13 }
  0x97   : > { %217 = vst.msk [vmem:[%s169_s17 + $0x18] sm:$0xf] %vm214_vm1, %v195_v12 }
  0x9d   : > { %v203_v14 = vpop.permute.xlu1 %202  ;;  %v201_v15 = vpop.permute.xlu0 %200 }
  0x9e   : > { %221 = vst.msk [vmem:[%s169_s17 + $0x38] sm:$0xf] %vm214_vm1, %v203_v14 }
  0x9f   : > { %220 = vst.msk [vmem:[%s169_s17 + $0x30] sm:$0xff] %vm212_vm0, %v201_v15 }
  0xa0 PF: > { %s14_s11 = sadd.s32 1, %s476_s11   ;;  %s586_s6 = smov %s460_s7 }
  0xa1   : > { %p11_p0 = scmp.ge.s32.totalorder %s14_s11, 4   ;;  %s587_s7 = smov %s464_s8 }
  0xa2   : > { %s588_s8 = smov %s540_s18  ;;  %s589_s9 = smov %s472_s10 }
  0xa3   : > { %s590_s10 = smov %s592_s13  ;;  %13 = sbr.rel (!%p11_p0) target bundleno = 4 (0x4), region = 64 }
  0xa8   :  { %255 = vsyncpa [#allocation3], 1 }
  0xa9   :  { %257 = vsyncpa [#allocation3 + $0x1], 1 }

</bundles_post_ra>
